<compile_context>
chip_gen: v5e
topology: v5e:2x2
jax: 0.10.0
libtpu: 0.0.40
codegen_flags: <defaults>
</compile_context>

<pallas_src>
import functools

import jax
import jax.numpy as jnp
from jax.experimental import pallas as pl
from jax.experimental.pallas import tpu as pltpu

EPS = 1e-3  # BatchNorm2d(n, eps=0.001)


# --------------------------------------------------------------------------
# Hardware / sizing helpers
# --------------------------------------------------------------------------
def _vmem_capacity_bytes():
    """Per-TensorCore VMEM capacity (generation aware, with safe fallbacks)."""
    try:
        return int(pltpu.get_tpu_info().vmem_capacity_bytes)
    except Exception:
        pass
    try:
        kind = jax.devices()[0].device_kind.lower()
        if "v7" in kind:
            return 64 * 1024 * 1024
        if any(v in kind for v in ("v6", "v5", "v4")):
            return 128 * 1024 * 1024
    except Exception:
        pass
    return 64 * 1024 * 1024  # conservative default


def _pick_tile(hw, c, slab_target_bytes, itemsize):
    """Pick the HW tile (lane) width.

    Returns either:
      * hw itself (single full-extent block, no masking), or
      * a 128-multiple divisor of hw close to the cap (no masking), or
      * the 128-multiple cap itself (grid uses cdiv; stats pass masks the tail,
        pass-2 tail writes are clipped by Pallas).
    """
    cap = (slab_target_bytes // (itemsize * max(c, 1))) // 128 * 128
    cap = max(128, cap)
    if hw <= cap:
        return hw
    best = 0
    d = cap
    while d >= 128:
        if hw % d == 0:
            best = d
            break
        d -= 128
    if best >= cap // 2:
        return best
    return cap


# --------------------------------------------------------------------------
# Fused single-pass kernel (x fully VMEM-resident)
# --------------------------------------------------------------------------
def _fused_kernel(w_ref, gamma_ref, beta_ref, x_ref, o_ref, *, inv_m):
    # w_ref:       (2,)       SMEM  [w_0, w_1]
    # gamma/beta:  (C, 1)     VMEM
    # x_ref/o_ref: (N, C, HW) VMEM (whole arrays resident)
    n_imgs = x_ref.shape[0]
    c = x_ref.shape[1]
    zeros = jnp.zeros((c, 1), jnp.float32)

    def sum_body(n, s):
        xn = x_ref[n].astype(jnp.float32)                       # (C, HW)
        return s + jnp.sum(xn, axis=-1, keepdims=True)

    mean = jax.lax.fori_loop(0, n_imgs, sum_body, zeros) * inv_m  # (C, 1)

    def var_body(n, q):
        d = x_ref[n].astype(jnp.float32) - mean
        return q + jnp.sum(d * d, axis=-1, keepdims=True)

    var = jax.lax.fori_loop(0, n_imgs, var_body, zeros) * inv_m   # biased
    inv_std = jax.lax.rsqrt(var + EPS)

    w0 = w_ref[0]
    w1 = w_ref[1]
    a = w1 * gamma_ref[...] * inv_std                             # (C, 1)
    # out = w0*x + w1*(gamma*(x-mean)*inv_std + beta) = scale*x + bias
    scale = w0 + a
    bias = w1 * beta_ref[...] - a * mean

    def norm_body(n, carry):
        xn = x_ref[n].astype(jnp.float32)
        o_ref[n] = (xn * scale + bias).astype(o_ref.dtype)
        return carry

    jax.lax.fori_loop(0, n_imgs, norm_body, 0)


def _adaptive_norm_fused(x3, w0, w1, gamma_c1, beta_c1, m_total, vmem_cap):
    n, c, hw = x3.shape
    itemsize = jnp.dtype(x3.dtype).itemsize
    arr_bytes = n * c * hw * itemsize
    vmem_limit = int(min(0.9 * vmem_cap, 2 * arr_bytes + (16 << 20)))
    w = jnp.stack([w0, w1])

    return pl.pallas_call(
        functools.partial(_fused_kernel, inv_m=1.0 / m_total),
        out_shape=jax.ShapeDtypeStruct((n, c, hw), x3.dtype),
        in_specs=[
            pl.BlockSpec(memory_space=pltpu.MemorySpace.SMEM),   # w
            pl.BlockSpec(memory_space=pltpu.MemorySpace.VMEM),   # gamma
            pl.BlockSpec(memory_space=pltpu.MemorySpace.VMEM),   # beta
            pl.BlockSpec(memory_space=pltpu.MemorySpace.VMEM),   # x
        ],
        out_specs=pl.BlockSpec(memory_space=pltpu.MemorySpace.VMEM),
        compiler_params=pltpu.CompilerParams(vmem_limit_bytes=vmem_limit),
        cost_estimate=pl.CostEstimate(
            flops=6 * n * c * hw, transcendentals=c,
            bytes_accessed=2 * arr_bytes),
    )(w, gamma_c1, beta_c1, x3)


# --------------------------------------------------------------------------
# Two-pass tiled kernels
# --------------------------------------------------------------------------
def _stats_kernel(x_ref, sum_ref, sq_ref, *, hw, tile):
    # x_ref:        (1, C, tile) current HW tile of image n
    # sum_ref/sq_ref: (1, C, 1)  per-image partial accumulators (output blocks
    #                            indexed by n only -> resident across the
    #                            "arbitrary" tile axis; N axis is "parallel").
    t = pl.program_id(1)

    @pl.when(t == 0)
    def _init():
        sum_ref[...] = jnp.zeros_like(sum_ref)
        sq_ref[...] = jnp.zeros_like(sq_ref)

    x = x_ref[0].astype(jnp.float32)                             # (C, tile)
    if hw % tile != 0:  # static: only emit masking when the grid is ragged
        lane = jax.lax.broadcasted_iota(jnp.int32, x.shape, dimension=1)
        valid = (t * tile + lane) < hw
        x = jnp.where(valid, x, 0.0)
    sum_ref[0] += jnp.sum(x, axis=-1, keepdims=True)
    sq_ref[0] += jnp.sum(x * x, axis=-1, keepdims=True)


def _norm_kernel(scale_ref, bias_ref, x_ref, o_ref):
    # scale/bias: (C, 1) constant blocks -> fetched once, VMEM-resident.
    # x_ref/o_ref: (1, C, tile). Tail blocks may be clipped; writes past the
    # array bound are dropped by Pallas, so no masking is needed here.
    x = x_ref[0].astype(jnp.float32)
    o_ref[0] = (x * scale_ref[...] + bias_ref[...]).astype(o_ref.dtype)


def _adaptive_norm_two_pass(x3, w0, w1, gamma_c1, beta_c1, m_total, vmem_cap):
    n, c, hw = x3.shape
    itemsize = jnp.dtype(x3.dtype).itemsize
    slab_target = max(1 << 20, vmem_cap // 8)       # ~8 MiB (v7x) / 16 MiB (v5e/v6e)
    tile = _pick_tile(hw, c, slab_target, itemsize)
    n_tiles = pl.cdiv(hw, tile)
    slab_bytes = c * tile * itemsize
    vmem_limit = int(min(0.9 * vmem_cap,
                         max(32 << 20, 4 * slab_bytes + (8 << 20))))

    # ---- pass 1: per-image partial (sum, sumsq) ---------------------------
    sums, sqs = pl.pallas_call(
        functools.partial(_stats_kernel, hw=hw, tile=tile),
        out_shape=(jax.ShapeDtypeStruct((n, c, 1), jnp.float32),
                   jax.ShapeDtypeStruct((n, c, 1), jnp.float32)),
        grid=(n, n_tiles),
        in_specs=[pl.BlockSpec((1, c, tile), lambda i, t: (i, 0, t))],
        out_specs=(pl.BlockSpec((1, c, 1), lambda i, t: (i, 0, 0)),
                   pl.BlockSpec((1, c, 1), lambda i, t: (i, 0, 0))),
        compiler_params=pltpu.CompilerParams(
            dimension_semantics=("parallel", "arbitrary"),
            vmem_limit_bytes=vmem_limit),
        cost_estimate=pl.CostEstimate(
            flops=3 * n * c * hw, transcendentals=0,
            bytes_accessed=n * c * hw * itemsize + 2 * n * c * 4),
    )(x3)

    # ---- O(C) fold: mean/var -> per-channel (scale, bias), in plain jnp ---
    total = jnp.sum(sums[:, :, 0], axis=0)                       # (C,)
    totsq = jnp.sum(sqs[:, :, 0], axis=0)
    mean = total / m_total
    var = totsq / m_total - mean * mean       # biased; E[x^2]-mean^2 (see note)
    inv_std = jax.lax.rsqrt(var + EPS)
    a = w1 * gamma_c1[:, 0] * inv_std
    scale = (w0 + a).reshape(c, 1)
    bias = (w1 * beta_c1[:, 0] - a * mean).reshape(c, 1)

    # ---- pass 2: out = scale_c * x + bias_c -------------------------------
    out3 = pl.pallas_call(
        _norm_kernel,
        out_shape=jax.ShapeDtypeStruct((n, c, hw), x3.dtype),
        grid=(n, n_tiles),
        in_specs=[
            pl.BlockSpec((c, 1), lambda i, t: (0, 0)),           # scale
            pl.BlockSpec((c, 1), lambda i, t: (0, 0)),           # bias
            pl.BlockSpec((1, c, tile), lambda i, t: (i, 0, t)),  # x tile
        ],
        out_specs=pl.BlockSpec((1, c, tile), lambda i, t: (i, 0, t)),
        compiler_params=pltpu.CompilerParams(
            dimension_semantics=("parallel", "parallel"),
            vmem_limit_bytes=vmem_limit),
        cost_estimate=pl.CostEstimate(
            flops=2 * n * c * hw, transcendentals=0,
            bytes_accessed=2 * n * c * hw * itemsize),
    )(scale, bias, x3)
    return out3


# --------------------------------------------------------------------------
# Public entry point
# --------------------------------------------------------------------------
def adaptive_norm(x_nchw, w0, w1, gamma, beta, *, mode="auto"):
    """out = w0*x + w1*BatchNorm2d(x) (training-mode batch stats).

    mode: "auto" (VMEM-resident fused path when it fits, else tiled two-pass),
          "fused", or "two_pass".
    """
    n, c, h, w_sp = x_nchw.shape
    hw = h * w_sp
    m_total = n * hw
    x3 = x_nchw.reshape(n, c, hw)                  # free reshape, no transpose
    itemsize = jnp.dtype(x_nchw.dtype).itemsize
    vmem_cap = _vmem_capacity_bytes()

    w0 = jnp.asarray(w0, jnp.float32).reshape(())
    w1 = jnp.asarray(w1, jnp.float32).reshape(())
    gamma_c1 = jnp.asarray(gamma, jnp.float32).reshape(c, 1)
    beta_c1 = jnp.asarray(beta, jnp.float32).reshape(c, 1)

    arr_bytes = n * c * hw * itemsize
    if mode == "fused":
        use_fused = True
    elif mode == "two_pass":
        use_fused = False
    else:
        use_fused = 2 * arr_bytes <= int(0.55 * vmem_cap)

    if use_fused:
        out3 = _adaptive_norm_fused(x3, w0, w1, gamma_c1, beta_c1,
                                    m_total, vmem_cap)
    else:
        out3 = _adaptive_norm_two_pass(x3, w0, w1, gamma_c1, beta_c1,
                                       m_total, vmem_cap)
    return out3.reshape(n, c, h, w_sp)


def adaptive_norm_ref(x, w0, w1, gamma, beta):
    """Pure-JAX reference matching PyTorch training-mode forward."""
    mean = jnp.mean(x, axis=(0, 2, 3), keepdims=True)
    var = jnp.mean((x - mean) ** 2, axis=(0, 2, 3), keepdims=True)
    x_hat = (x - mean) / jnp.sqrt(var + EPS)
    bn = gamma.reshape(1, -1, 1, 1) * x_hat + beta.reshape(1, -1, 1, 1)
    return w0 * x + w1 * bn


if __name__ == "__main__":
    # AdaptiveNorm(n=C) with x of shape (N, C, H, W).
    N, C, H, W = 2, 4, 16, 16
    key = jax.random.PRNGKey(0)
    kx, kg, kb = jax.random.split(key, 3)
    x = jax.random.normal(kx, (N, C, H, W), dtype=jnp.float32)

    # Non-trivial (but deterministic) parameters so the BN branch is exercised.
    w0 = jnp.array(0.9, dtype=jnp.float32)
    w1 = jnp.array(0.4, dtype=jnp.float32)
    gamma = 1.0 + 0.1 * jax.random.normal(kg, (C,), dtype=jnp.float32)
    beta = 0.1 * jax.random.normal(kb, (C,), dtype=jnp.float32)

    ref = adaptive_norm_ref(x, w0, w1, gamma, beta)

    # Exercise both code paths (fused VMEM-resident and tiled two-pass).
    out_fused = jax.block_until_ready(
        adaptive_norm(x, w0, w1, gamma, beta, mode="fused"))
    out_tiled = jax.block_until_ready(
        adaptive_norm(x, w0, w1, gamma, beta, mode="two_pass"))

    assert out_fused.shape == (N, C, H, W)
    assert out_tiled.shape == (N, C, H, W)
    assert jnp.allclose(out_fused, ref, atol=3e-5, rtol=3e-5), "fused mismatch"
    assert jnp.allclose(out_tiled, ref, atol=3e-5, rtol=3e-5), "two-pass mismatch"

    print("KERNEL_OK")
</pallas_src>

<mosaic_0001>
module attributes {stable_mosaic.version = 11 : i64} {
  func.func @_fused_kernel(%arg0: memref<2xf32, #tpu.memory_space<smem>>, %arg1: memref<4x1xf32, #tpu.memory_space<vmem>>, %arg2: memref<4x1xf32, #tpu.memory_space<vmem>>, %arg3: memref<2x4x256xf32, #tpu.memory_space<vmem>>, %arg4: memref<2x4x256xf32, #tpu.memory_space<vmem>>) attributes {dimension_semantics = [], scalar_prefetch = 0 : i64, scratch_operands = 0 : i64, tpu.core_type = #tpu.core_type<tc>} {
    %cst = arith.constant 0.000000e+00 : f32
    %0 = vector.broadcast %cst : f32 to vector<4x1xf32>
    %c0_i32 = arith.constant 0 : i32
    %c2_i32 = arith.constant 2 : i32
    %1 = arith.addi %c0_i32, %c2_i32 : i32
    %c1_i32 = arith.constant 1 : i32
    %2 = scf.for %arg5 = %c0_i32 to %1 step %c1_i32 iter_args(%arg6 = %0) -> (vector<4x1xf32>)  : i32 {
      %26 = arith.index_cast %arg5 : i32 to index
      %c0_16 = arith.constant 0 : index
      %c0_17 = arith.constant 0 : index
      %27 = vector.load %arg3[%26, %c0_16, %c0_17] : memref<2x4x256xf32, #tpu.memory_space<vmem>>, vector<1x4x256xf32>
      %28 = vector.shape_cast %27 : vector<1x4x256xf32> to vector<4x256xf32>
      %cst_18 = arith.constant dense<0.000000e+00> : vector<4xf32>
      %29 = vector.multi_reduction <add>, %28, %cst_18 [1] : vector<4x256xf32> to vector<4xf32>
      %30 = vector.shape_cast %29 : vector<4xf32> to vector<4x1xf32>
      %31 = arith.addf %arg6, %30 : vector<4x1xf32>
      scf.yield %31 : vector<4x1xf32>
    }
    %c2_i32_0 = arith.constant 2 : i32
    %cst_1 = arith.constant 0.001953125 : f32
    %3 = vector.broadcast %cst_1 : f32 to vector<4x1xf32>
    %4 = arith.mulf %2, %3 : vector<4x1xf32>
    %c0_i32_2 = arith.constant 0 : i32
    %c2_i32_3 = arith.constant 2 : i32
    %5 = arith.addi %c0_i32_2, %c2_i32_3 : i32
    %c1_i32_4 = arith.constant 1 : i32
    %6 = scf.for %arg5 = %c0_i32_2 to %5 step %c1_i32_4 iter_args(%arg6 = %0) -> (vector<4x1xf32>)  : i32 {
      %26 = arith.index_cast %arg5 : i32 to index
      %c0_16 = arith.constant 0 : index
      %c0_17 = arith.constant 0 : index
      %27 = vector.load %arg3[%26, %c0_16, %c0_17] : memref<2x4x256xf32, #tpu.memory_space<vmem>>, vector<1x4x256xf32>
      %28 = vector.shape_cast %27 : vector<1x4x256xf32> to vector<4x256xf32>
      %29 = vector.broadcast %4 : vector<4x1xf32> to vector<4x256xf32>
      %30 = arith.subf %28, %29 : vector<4x256xf32>
      %31 = arith.mulf %30, %30 : vector<4x256xf32>
      %cst_18 = arith.constant dense<0.000000e+00> : vector<4xf32>
      %32 = vector.multi_reduction <add>, %31, %cst_18 [1] : vector<4x256xf32> to vector<4xf32>
      %33 = vector.shape_cast %32 : vector<4xf32> to vector<4x1xf32>
      %34 = arith.addf %arg6, %33 : vector<4x1xf32>
      scf.yield %34 : vector<4x1xf32>
    }
    %c2_i32_5 = arith.constant 2 : i32
    %cst_6 = arith.constant 0.001953125 : f32
    %7 = vector.broadcast %cst_6 : f32 to vector<4x1xf32>
    %8 = arith.mulf %6, %7 : vector<4x1xf32>
    %cst_7 = arith.constant 1.000000e-03 : f32
    %9 = vector.broadcast %cst_7 : f32 to vector<4x1xf32>
    %10 = arith.addf %8, %9 : vector<4x1xf32>
    %11 = math.rsqrt %10 : vector<4x1xf32>
    %c0 = arith.constant 0 : index
    %12 = memref.load %arg0[%c0] : memref<2xf32, #tpu.memory_space<smem>>
    %c1 = arith.constant 1 : index
    %13 = memref.load %arg0[%c1] : memref<2xf32, #tpu.memory_space<smem>>
    %c0_8 = arith.constant 0 : index
    %c0_9 = arith.constant 0 : index
    %14 = vector.load %arg1[%c0_8, %c0_9] : memref<4x1xf32, #tpu.memory_space<vmem>>, vector<4x1xf32>
    %15 = vector.broadcast %13 : f32 to vector<4x1xf32>
    %16 = arith.mulf %15, %14 : vector<4x1xf32>
    %17 = arith.mulf %16, %11 : vector<4x1xf32>
    %18 = vector.broadcast %12 : f32 to vector<4x1xf32>
    %19 = arith.addf %18, %17 : vector<4x1xf32>
    %c0_10 = arith.constant 0 : index
    %c0_11 = arith.constant 0 : index
    %20 = vector.load %arg2[%c0_10, %c0_11] : memref<4x1xf32, #tpu.memory_space<vmem>>, vector<4x1xf32>
    %21 = vector.broadcast %13 : f32 to vector<4x1xf32>
    %22 = arith.mulf %21, %20 : vector<4x1xf32>
    %23 = arith.mulf %17, %4 : vector<4x1xf32>
    %24 = arith.subf %22, %23 : vector<4x1xf32>
    %c0_i32_12 = arith.constant 0 : i32
    %c2_i32_13 = arith.constant 2 : i32
    %25 = arith.addi %c0_i32_12, %c2_i32_13 : i32
    %c1_i32_14 = arith.constant 1 : i32
    scf.for %arg5 = %c0_i32_12 to %25 step %c1_i32_14  : i32 {
      %26 = arith.index_cast %arg5 : i32 to index
      %c0_16 = arith.constant 0 : index
      %c0_17 = arith.constant 0 : index
      %27 = vector.load %arg3[%26, %c0_16, %c0_17] : memref<2x4x256xf32, #tpu.memory_space<vmem>>, vector<1x4x256xf32>
      %28 = vector.shape_cast %27 : vector<1x4x256xf32> to vector<4x256xf32>
      %29 = vector.broadcast %19 : vector<4x1xf32> to vector<4x256xf32>
      %30 = arith.mulf %28, %29 : vector<4x256xf32>
      %31 = vector.broadcast %24 : vector<4x1xf32> to vector<4x256xf32>
      %32 = arith.addf %30, %31 : vector<4x256xf32>
      %33 = arith.index_cast %arg5 : i32 to index
      %c0_18 = arith.constant 0 : index
      %c0_19 = arith.constant 0 : index
      %34 = vector.load %arg4[%33, %c0_18, %c0_19] : memref<2x4x256xf32, #tpu.memory_space<vmem>>, vector<1x4x256xf32>
      %35 = vector.shape_cast %34 : vector<1x4x256xf32> to vector<4x256xf32>
      %36 = vector.shape_cast %32 : vector<4x256xf32> to vector<1x4x256xf32>
      tpu.vector_store %arg4[%33, %c0_18, %c0_19], %36 {strides = array<i32>} : memref<2x4x256xf32, #tpu.memory_space<vmem>>, vector<1x4x256xf32>,
    }
    %c2_i32_15 = arith.constant 2 : i32
    return
  }
}

</mosaic_0001>

<bundles_post_ra>
// kernel: tpu_custom_call.1
= control target key start
LH: loop header
LB: loop body
LE: loop exit
PB: predicated region body
PF: predicated region fallthrough
CT: control target
= control target key end

     0   :  { %9 = vsyncpa [#allocation5], 0  ;;  %s440_s0 = inlined_call_operand.vmem [shape: f32[2], index: 0, kind: input, shape index: {}]   ;;  %s441_s1 = inlined_call_operand.vmem [shape: f32[4,1], index: 1, kind: input, shape index: {}]   ;;  %s442_s2 = inlined_call_operand.vmem [shape: f32[4,1], index: 2, kind: input, shape index: {}]   ;;  %s443_s3 = inlined_call_operand.hbm [shape: f32[2,4,256], index: 3, kind: input, shape index: {}]   ;;  %s444_s4 = inlined_call_operand.hbm [shape: f32[2,4,256], index: 4, kind: output, shape index: {}]  }
   0x1   :  { %10 = vsyncpa [#allocation3], 0 }
   0x2   :  { %11 = vsyncpa [#allocation4], 0  ;;  %s17_s17 = sshll.u32 %s440_s0, 4  ;;  %s29_s20 = sshll.u32 %s443_s3, 4  ;;  %s18_s17 = int_to_ptr.vmem [resolvable:$true] %s17_s17  ;;  %s30_s20 = int_to_ptr.hbm [resolvable:$true] %s29_s20 }
   0x3   :  { %s378_s21 = smov [#allocation2]   ;;  %s379_s22 = smov [#allocation6]  }
   0x4   :  { %20 = dma.vmem_to_smem %s18_s17, 16, %s378_s21, [#allocation5]  }
   0x5   :  { %s31_s23 = sshll.u32 %s379_s22, 4  ;;  %s380_s24 = smov 128   ;;  %s32_s23 = int_to_ptr.vmem [resolvable:$true] %s31_s23 }
   0x6   :  { %s381_s25 = smov 8  }
   0x7   :  { %37 = dma.hbm_to_vmem [thread:$0]  %s30_s20, 256, %s32_s23, [#allocation3], %s380_s24, %s380_s24, %s381_s25  }
   0x8   :  { %352 = dma.done.wait [#allocation5], 16  }
   0x9   :  { %353 = vsyncadd [#allocation5], 4294967280 }
   0xa   :  { %354 = dma.done.wait [#allocation3], 256  }
   0xb   :  { %355 = vsyncadd [#allocation3], 4294967040 }
   0xc   :  { %46 = sfence }
   0xd   :  { %v358_v0 = vmov 0.0   ;;  %s362_s0 = smov 0  }
   0xe LB: > { %s218_s3 = sshll.u32 %s364_s0, 3  ;;  %vm64_vm0 = vcmask 1043456   ;;  %s52_s0 = sadd.s32 1, %s364_s0   ;;  %s364_s0 = sphi %s362_s0, %s52_s0   ;;  %v360_v0 = vphi %v358_v0, %v359_v0  }
   0xf   : > { %s56_s26 = scalar_lea.vmem [#allocation6], %s218_s3  ;;  %p49_p0 = scmp.ge.s32.totalorder %s52_s0, 2  }
  0x10   : > { %v57_v1 = vld [vmem:[%s56_s26] sm:$0xff]  ;;  %v366_v10 = vmov (%p49_p0), 0.0   ;;  %s370_s27 = smov (%p49_p0), 0  }
  0x11   : > { %59 = vst [vmem:[#allocation1] ss:$2 sm:$0xff] %v57_v1 }
  0x18   : > { %v60_v2 = vld.sshfl [vmem:[#allocation1] sm:$0xff pattern:$0x75316420]  ;;  %v61_v3 = vld.sshfl [vmem:[#allocation1 + $0x8] sm:$0xff pattern:$0x75316420] }
  0x19   : > { %v65_v4 = vsel %vm64_vm0, %v60_v2, 0.0  ;;  %v66_v5 = vsel %vm64_vm0, %v61_v3, 0.0 }
  0x1a   : > { %v67_v6 = vadd.f32 %v66_v5, %v65_v4 }
  0x1c   : > { %68 = vadd.xlane.f32.xlu0 %v67_v6 }
  0x8e   :  { %51 = sbr.rel (!%p49_p0) target bundleno = 14 (0xe), region = 69 }
  0x8f   : > { %v69_v7 = vpop.xlane.xlu0 %68 }
  0x90   : > { %v70_v8 = vadd.f32 %v360_v0, %v69_v7  }
  0x92   : > { %v359_v0 = vmov %v70_v8   ;;  %v71_v9 = vmul.f32 (%p49_p0), 0.001953125, %v70_v8 }
  0x93 LB: > { %v382_v11 = vmov 839922192   ;;  %s219_s28 = sshll.u32 %s372_s27, 3  ;;  %s77_s27 = sadd.s32 1, %s372_s27   ;;  %s372_s27 = sphi %s370_s27, %s77_s27   ;;  %v368_v10 = vphi %v366_v10, %v367_v10  }
  0x94   : > { %v85_v12 = vunpack.c.l.s4 %v382_v11  ;;  %s81_s29 = scalar_lea.vmem [#allocation6], %s219_s28  ;;  %p74_p1 = scmp.ge.s32.totalorder %s77_s27, 2  }
  0x95   : > { %v82_v14 = vld [vmem:[%s81_s29] sm:$0xff]  ;;  %s214_s30 = sld [smem:[#allocation2 + $0x1]] (%p74_p1)  ;;  %s374_s10 = smov (%p74_p1), 0  }
  0x96   : > { %v421_v13 = vunpack.c.0.s8 %v85_v12  ;;  %s116_s5 = sld [smem:[#allocation2]] (%p74_p1)  ;;  %v118_v31 = vld [vmem:[%s441_s1] sm:$0xf] (%p74_p1) }
  0x97   :  { %v124_v36 = vld [vmem:[%s442_s2] sm:$0xf] (%p74_p1) }
  0x98   : > { %v87_v15 = vperm.slane %v71_v9, %v421_v13 }
  0x9a   : > { %v89_v16 = vsub.f32 %v82_v14, %v87_v15 }
  0x9b   :  { %v119_v32 = vstv (%p74_p1), %s214_s30 }
  0x9c   : > { %v90_v17 = vmul.f32 %v89_v16, %v89_v16  ;;  %v120_v34 = vmul.f32 (%p74_p1), %v119_v32, %v118_v31  ;;  %v122_v38 = vstv (%p74_p1), %s116_s5  ;;  %v125_v40 = vmul.f32 (%p74_p1), %v124_v36, %v119_v32 }
  0x9e   : > { %92 = vst [vmem:[#allocation1] ss:$2 sm:$0xff] %v90_v17 }
  0xa5   : > { %v93_v18 = vld.sshfl [vmem:[#allocation1] sm:$0xff pattern:$0x75316420]  ;;  %v94_v19 = vld.sshfl [vmem:[#allocation1 + $0x8] sm:$0xff pattern:$0x75316420] }
  0xa6   : > { %v98_v20 = vsel %vm64_vm0, %v93_v18, 0.0  ;;  %v99_v21 = vsel %vm64_vm0, %v94_v19, 0.0 }
  0xa7   : > { %v100_v22 = vadd.f32 %v99_v21, %v98_v20 }
  0xa9   : > { %101 = vadd.xlane.f32.xlu0 %v100_v22 }
 0x11b   :  { %76 = sbr.rel (!%p74_p1) target bundleno = 147 (0x93), region = 80 }
 0x11c   : > { %v102_v23 = vpop.xlane.xlu0 %101 }
 0x11d   : > { %v103_v24 = vadd.f32 %v368_v10, %v102_v23  }
 0x11f   : > { %v367_v10 = vmov %v103_v24   ;;  %v104_v25 = vmul.f32 (%p74_p1), 0.001953125, %v103_v24 }
 0x121   :  { %v105_v26 = vadd.f32 0.001, %v104_v25 }
 0x123   :  { %269 = vrsqrt.f32 %v105_v26  ;;  %vm112_vm1 = vweird.f32 %v105_v26 }
 0x129   :  { %v270_v27 = vpop.eup %269 }
 0x12a   :  { %v107_v28 = vmul.f32 %v270_v27, %v105_v26  ;;  %vm113_vm2 = vweird.f32 %v270_v27 }
 0x12b   :  { %vm114_vm3 = vmor %vm112_vm1, %vm113_vm2 }
 0x12c   :  { %v108_v29 = vmul.f32 %v270_v27, %v107_v28 }
 0x12e   :  { %v109_v30 = vmul.f32 0.5, %v108_v29 }
 0x130   :  { %v110_v33 = vsub.f32 1.5, %v109_v30 }
 0x132   :  { %v111_v35 = vmul.f32 %v270_v27, %v110_v33 }
 0x134   :  { %v115_v37 = vsel %vm114_vm3, %v270_v27, %v111_v35 }
 0x135   :  { %v121_v39 = vmul.f32 %v120_v34, %v115_v37 }
 0x137   :  { %v123_v41 = vadd.f32 %v122_v38, %v121_v39  ;;  %v126_v42 = vmul.f32 %v121_v39, %v71_v9 }
 0x139   :  { %v127_v43 = vsub.f32 %v125_v40, %v126_v42 }
 0x13a LB: > { %v383_v44 = vmov 0   ;;  %s220_s1 = sshll.u32 %s376_s10, 3  ;;  %s133_s10 = sadd.s32 1, %s376_s10   ;;  %s376_s10 = sphi %s374_s10, %s133_s10  }
 0x13b   : > { %271 = vset.pattern.permute.xlu0 %v383_v44  ;;  %s136_s2 = scalar_lea.vmem [#allocation6], %s220_s1  ;;  %s159_s11 = scalar_lea.vmem [#allocation7], %s220_s1 }
 0x13c   : > { %140 = vperm.xlu0 %271, %v123_v41   ;;  %v137_v47 = vld [vmem:[%s136_s2] sm:$0xff]  ;;  %p130_p2 = scmp.ge.s32.totalorder %s133_s10, 2  }
 0x13d   :  { %s167_s14 = sshll.u32 (%p130_p2), %s444_s4, 4  ;;  %s384_s15 = smov (%p130_p2), [#allocation7]   ;;  %s168_s14 = int_to_ptr.hbm [resolvable:$true] %s167_s14 }
 0x13e   :  { %s165_s16 = sshll.u32 (%p130_p2), %s384_s15, 4  ;;  %s166_s16 = int_to_ptr.vmem [resolvable:$true] %s165_s16 }
 0x144   : > { %150 = vperm.xlu0 %271, %v127_v43  }
 0x1ae   : > { %v141_v45 = vpop.permute.xlu0 %140 }
 0x1af   : > { %v145_v46 = vperm.slane %v141_v45, %v421_v13 }
 0x1b1   : > { %v147_v49 = vmul.f32 %v145_v46, %v137_v47 }
 0x1b6   : > { %v151_v48 = vpop.permute.xlu0 %150 }
 0x1b7   : > { %v155_v50 = vperm.slane %v151_v48, %v421_v13  ;;  %132 = sbr.rel (!%p130_p2) target bundleno = 314 (0x13a), region = 91 }
 0x1b9   : > { %v157_v51 = vadd.f32 %v155_v50, %v147_v49 }
 0x1bb   : > { %160 = vst [vmem:[%s159_s11] sm:$0xff] %v157_v51 }
 0x1bc   :  { %173 = dma.vmem_to_hbm [thread:$0]  %s166_s16, 256, %s168_s14, [#allocation4], %s380_s24, %s380_s24, %s381_s25  }
 0x1bd   :  { %356 = dma.done.wait [#allocation4], 256  }
 0x1be   :  { %357 = vsyncadd [#allocation4], 4294967040 }
 0x1bf   :  { %178 = vsyncpa [#allocation3], 1 }
 0x1c0   :  { %179 = vsyncpa [#allocation4], 1 }
 0x1c1   :  { %180 = vsyncpa [#allocation5], 1 }

</bundles_post_ra>
